<compile_context>
chip_gen: v7x
topology: tpu7x:2x2x1
jax: 0.10.0
libtpu: 0.0.40
codegen_flags: <defaults>
</compile_context>

<pallas_src>
import numpy as np
import jax
import jax.numpy as jnp
from jax.experimental import pallas as pl
from jax.experimental.pallas import tpu as pltpu

LANE = 128
SUBLANE = 8


def _round_up(x, m):
    return ((x + m - 1) // m) * m


def _num_tensorcores():
    """Best-effort TensorCore count of device 0 (2 on v7x-style parts)."""
    try:
        n = getattr(jax.devices()[0], "num_cores", None)
        return max(1, int(n)) if n else 1
    except Exception:
        return 1


def _make_mlp_kernel(n_inputs, n_layers, p_h, p_o, out_rows, feature_major):
    """Fused MLP: (first linear via VPU broadcast) -> [tanh -> linear]*L ->
    tanh -> output linear.  Layers are unrolled at trace time; every matmul is
    a lane-dense MXU op on zero-padded weights (zero padding is stable under
    tanh and matmul, so results match the unpadded math)."""

    def kernel(x_ref, wh_ref, wo_ref, fb_ref, o_ref):
        x = x_ref[...].astype(jnp.float32)            # (TB, n_inputs)
        fb = fb_ref[...].astype(jnp.float32)          # (R, P_max), 1 load

        # First linear, K = n_inputs (tiny): broadcast outer product on the
        # VPU -- avoids MXU push/drain latency for a K=1 matmul.
        h = fb[n_inputs, :p_h][None, :]               # b0 row, (1, P_h)
        for k in range(n_inputs):
            h = h + x[:, k:k + 1] * fb[k, :p_h][None, :]

        # Hidden stack: Tanh -> Linear.  Kept in f32 on the MXU to hold the
        # 1e-4 reference tolerance (bf16 inputs would ~3x MXU throughput but
        # only matter once the kernel is MXU-bound at large B).
        for i in range(n_layers):
            h = jnp.tanh(h)
            h = (jnp.dot(h, wh_ref[i], preferred_element_type=jnp.float32)
                 + fb[n_inputs + 1 + i, :p_h][None, :])

        # Final Tanh + output linear: (TB, P_h) @ (P_h, P_o).
        h = jnp.tanh(h)
        y = (jnp.dot(h, wo_ref[...], preferred_element_type=jnp.float32)
             + fb[n_inputs + n_layers + 1, :p_o][None, :])   # (TB, P_o)

        if feature_major:
            # Epilogue XLU transpose (MXU/VPU idle here): store feature-major
            # so lanes = TB stay dense and only round_up(out_dim, 8) rows are
            # written back instead of all P_o padded columns.  Also fuses the
            # einops Rearrange transpose into the kernel.
            o_ref[...] = jnp.transpose(y)[:out_rows, :].astype(o_ref.dtype)
        else:
            o_ref[...] = y.astype(o_ref.dtype)

    return kernel


def init_mlp_params(key, *, shape_in, aif, n_layers, n_units,
                    n_inputs=1, neurons_out=1, dtype=jnp.float32):
    """Deterministic PyTorch-Linear-style init.  Returns unpacked params."""
    out_dim = neurons_out if aif else neurons_out * int(np.prod(shape_in))

    def linear(k, fan_in, fan_out):
        kw, kb = jax.random.split(k)
        bound = 1.0 / np.sqrt(fan_in)
        w = jax.random.uniform(kw, (fan_in, fan_out), dtype, -bound, bound)
        b = jax.random.uniform(kb, (fan_out,), dtype, -bound, bound)
        return w, b

    keys = jax.random.split(key, n_layers + 2)
    w0, b0 = linear(keys[0], n_inputs, n_units)
    wh_list, bh_list = [], []
    for i in range(n_layers):
        w, b = linear(keys[1 + i], n_units, n_units)
        wh_list.append(w)
        bh_list.append(b)
    if n_layers:
        wh = jnp.stack(wh_list, 0)                    # (L, n_units, n_units)
        bh = jnp.stack(bh_list, 0)                    # (L, n_units)
    else:
        wh = jnp.zeros((0, n_units, n_units), dtype)
        bh = jnp.zeros((0, n_units), dtype)
    wo, bo = linear(keys[-1], n_units, out_dim)
    return (w0, b0, wh, bh, wo, bo)


def pack_mlp_params(params, dtype=jnp.float32):
    """Pack params into 3 lane-padded arrays with DECOUPLED padding:
    hidden weights padded to (P_h, P_h), only the output weight to (P_h, P_o),
    so large out_dim configs don't quadratically inflate the VMEM-resident
    hidden weight stack."""
    w0, b0, wh, bh, wo, bo = params
    n_inputs, n_units = w0.shape
    n_layers = int(wh.shape[0])
    out_dim = int(wo.shape[1])
    P_h = _round_up(n_units, LANE)
    P_o = _round_up(out_dim, LANE)
    P_max = max(P_h, P_o)

    # Hidden weight stack (at least 1 slot so the BlockSpec is never empty).
    L_store = max(n_layers, 1)
    wh_stack = jnp.zeros((L_store, P_h, P_h), dtype)
    for i in range(n_layers):
        wh_stack = wh_stack.at[i, :n_units, :n_units].set(wh[i])

    # Output weight, padded only where needed.
    wo_pad = jnp.zeros((P_h, P_o), dtype)
    wo_pad = wo_pad.at[:n_units, :out_dim].set(wo)

    # First-layer rows + all biases in one small lane-padded slab.
    R = n_inputs + n_layers + 2
    fb = jnp.zeros((R, P_max), dtype)
    fb = fb.at[:n_inputs, :n_units].set(w0)
    fb = fb.at[n_inputs, :n_units].set(b0)
    for i in range(n_layers):
        fb = fb.at[n_inputs + 1 + i, :n_units].set(bh[i])
    fb = fb.at[n_inputs + n_layers + 1, :out_dim].set(bo)

    meta = dict(n_inputs=n_inputs, n_units=n_units, n_layers=n_layers,
                out_dim=out_dim, p_h=P_h, p_o=P_o, p_max=P_max)
    return (wh_stack, wo_pad, fb), meta


def mlp_forward(x, packed, meta, *, shape_in, aif, block_b=512, num_tc=None):
    wh_stack, wo_pad, fb = packed
    n_inputs = meta["n_inputs"]
    n_layers = meta["n_layers"]
    out_dim = meta["out_dim"]
    P_h = meta["p_h"]
    P_o = meta["p_o"]
    P_max = meta["p_max"]
    L_store = int(wh_stack.shape[0])
    R = int(fb.shape[0])
    B = int(x.shape[0])
    if num_tc is None:
        num_tc = _num_tensorcores()

    # Batch tiling.  Large tiles amortize the ~0.35us per-grid-step overhead;
    # when the whole batch fits in <= num_tc tiles, split it evenly across the
    # TensorCores (v7x) instead of capping at block_b, so neither core burns
    # cycles on padded rows while the other idles.
    # TODO(synk): in the tiny-batch repeated-call regime (B~8, grid=(1,)) the
    # cost is pure dispatch + weight DMA; amortize by stacking independent
    # calls into one pallas_call on an extra grid axis at the caller.
    if num_tc > 1 and B <= num_tc * block_b:
        TB = _round_up(max(1, -(-B // num_tc)), SUBLANE)
    else:
        TB = min(block_b, _round_up(B, SUBLANE))
    B_pad = _round_up(B, TB)
    if B_pad != B:
        x = jnp.pad(x, ((0, B_pad - B), (0, 0)))
    grid = (B_pad // TB,)

    # Feature-major (transposed) output whenever the batch tile is lane-dense:
    # fuses the XLA rearrange transpose into the kernel epilogue and trims the
    # padded out_dim -> P_o writeback.  At tiny / odd TB keep batch-major.
    feature_major = (TB % LANE == 0)
    out_rows = _round_up(out_dim, SUBLANE)
    if feature_major:
        out_shape = jax.ShapeDtypeStruct((out_rows, B_pad), jnp.float32)
        out_spec = pl.BlockSpec((out_rows, TB), lambda i: (0, i))
    else:
        out_shape = jax.ShapeDtypeStruct((B_pad, P_o), jnp.float32)
        out_spec = pl.BlockSpec((TB, P_o), lambda i: (i, 0))

    kernel = _make_mlp_kernel(n_inputs, n_layers, P_h, P_o, out_rows,
                              feature_major)

    def call(weight_pipeline):
        wkw = ({} if weight_pipeline is None
               else dict(pipeline_mode=weight_pipeline))
        return pl.pallas_call(
            kernel,
            out_shape=out_shape,
            grid=grid,
            in_specs=[
                pl.BlockSpec((TB, n_inputs), lambda i: (i, 0)),
                # Weights / biases: constant index_map -> fetched once, stay
                # VMEM-resident across all batch tiles; single-buffered since
                # the block never changes.
                pl.BlockSpec((L_store, P_h, P_h), lambda i: (0, 0, 0), **wkw),
                pl.BlockSpec((P_h, P_o), lambda i: (0, 0), **wkw),
                pl.BlockSpec((R, P_max), lambda i: (0, 0), **wkw),
            ],
            out_specs=out_spec,
            compiler_params=pltpu.CompilerParams(
                dimension_semantics=("parallel",)),
        )(x, wh_stack, wo_pad, fb)

    try:
        y = call(pl.Buffered(1))
    except Exception:
        # Fallback for Pallas versions that reject single-buffered inputs.
        y = call(None)

    # Layout epilogue = einops Rearrange + trailing [..., 0] (pure indexing).
    if feature_major:
        y = y[:out_dim, :B]                           # (out_dim, B) == y.T
        if not aif:
            d, h, w = shape_in
            # curves == 1, so x[..., 0] just drops the curves axis.
            return y.reshape(d, h, w, B)
        return y[0]                                   # (B,)
    y = y[:B, :out_dim]
    if not aif:
        d, h, w = shape_in
        y = y.reshape(B, 1, d, h, w)
        y = jnp.transpose(y, (2, 3, 4, 0, 1))         # (d, h, w, b, curves)
    # forward(): return x[..., 0]
    return y[..., 0]


def _reference_forward(x, params, *, shape_in, aif):
    """Plain-JAX reference mirroring the PyTorch nn.Sequential."""
    w0, b0, wh, bh, wo, bo = params
    h = x @ w0 + b0[None, :]
    for i in range(wh.shape[0]):
        h = jnp.tanh(h)
        h = h @ wh[i] + bh[i][None, :]
    h = jnp.tanh(h)
    y = h @ wo + bo[None, :]
    if not aif:
        d, hh, ww = shape_in
        y = y.reshape(x.shape[0], 1, d, hh, ww)
        y = jnp.transpose(y, (2, 3, 4, 0, 1))
    return y[..., 0]


if __name__ == "__main__":
    key = jax.random.PRNGKey(0)
    shape_in = (4, 4, 4)                 # (d, h, w)
    n_layers, n_units, n_inputs, neurons_out = 2, 32, 1, 1
    keys = jax.random.split(key, 8)

    params_f = init_mlp_params(keys[0], shape_in=shape_in, aif=False,
                               n_layers=n_layers, n_units=n_units,
                               n_inputs=n_inputs, neurons_out=neurons_out)
    packed_f, meta_f = pack_mlp_params(params_f)

    params_t = init_mlp_params(keys[1], shape_in=shape_in, aif=True,
                               n_layers=n_layers, n_units=n_units,
                               n_inputs=n_inputs, neurons_out=neurons_out)
    packed_t, meta_t = pack_mlp_params(params_t)

    def check(B, aif, params, packed, meta, k):
        x = jax.random.normal(k, (B, n_inputs), dtype=jnp.float32)
        out = jax.block_until_ready(
            mlp_forward(x, packed, meta, shape_in=shape_in, aif=aif))
        ref = _reference_forward(x, params, shape_in=shape_in, aif=aif)
        assert out.shape == ref.shape, (out.shape, ref.shape)
        err = float(jnp.max(jnp.abs(out - ref)))
        assert jnp.allclose(out, ref, atol=1e-4, rtol=1e-4), err
        return out

    # 1) Tiny batch, aif=False (module's typical use; batch-major, grid=(1,)).
    o1 = check(8, False, params_f, packed_f, meta_f, keys[2])
    assert o1.shape == (*shape_in, 8)

    # 2) Medium non-multiple batch, aif=False (balanced tile split on 2-TC
    #    parts, single padding-free tile on 1-TC parts).
    o2 = check(200, False, params_f, packed_f, meta_f, keys[3])
    assert o2.shape == (*shape_in, 200)

    # 3) Large batch, aif=False -> lane-dense feature-major fused output.
    o3 = check(512, False, params_f, packed_f, meta_f, keys[4])
    assert o3.shape == (*shape_in, 512)

    # 4) Tiny batch, aif=True (output is (B,)).
    o4 = check(16, True, params_t, packed_t, meta_t, keys[5])
    assert o4.shape == (16,)

    # 5) Large batch, aif=True -> feature-major with only 8 stored rows.
    o5 = check(256, True, params_t, packed_t, meta_t, keys[6])
    assert o5.shape == (256,)

    print("KERNEL_OK")
</pallas_src>

<mosaic_0001>
module attributes {stable_mosaic.version = 11 : i64} {
  func.func @kernel(%arg0: i32, %arg1: memref<8x1xf32, #tpu.memory_space<vmem>>, %arg2: memref<2x128x128xf32, #tpu.memory_space<vmem>>, %arg3: memref<128x128xf32, #tpu.memory_space<vmem>>, %arg4: memref<5x128xf32, #tpu.memory_space<vmem>>, %arg5: memref<8x128xf32, #tpu.memory_space<vmem>>) attributes {dimension_semantics = [#tpu.dimension_semantics<parallel>], iteration_bounds = array<i64: 1>, scalar_prefetch = 0 : i64, scratch_operands = 0 : i64, tpu.core_type = #tpu.core_type<tc>, window_params = [{transform_indices = @transform_0, window_bounds = array<i64: 8, 1>}, {pipeline_mode = #tpu.pipeline_mode<synchronous>, transform_indices = @transform_1, window_bounds = array<i64: 2, 128, 128>}, {pipeline_mode = #tpu.pipeline_mode<synchronous>, transform_indices = @transform_2, window_bounds = array<i64: 128, 128>}, {pipeline_mode = #tpu.pipeline_mode<synchronous>, transform_indices = @transform_3, window_bounds = array<i64: 5, 128>}, {transform_indices = @transform_4, window_bounds = array<i64: 8, 128>}]} {
    %c0 = arith.constant 0 : index
    %c0_0 = arith.constant 0 : index
    %0 = vector.load %arg1[%c0, %c0_0] : memref<8x1xf32, #tpu.memory_space<vmem>>, vector<8x1xf32>
    %c0_1 = arith.constant 0 : index
    %c0_2 = arith.constant 0 : index
    %1 = vector.load %arg4[%c0_1, %c0_2] : memref<5x128xf32, #tpu.memory_space<vmem>>, vector<5x128xf32>
    %2 = vector.extract_strided_slice %1 {offsets = [1, 0], sizes = [1, 128], strides = [1, 1]} : vector<5x128xf32> to vector<1x128xf32>
    %3 = vector.shape_cast %2 : vector<1x128xf32> to vector<128xf32>
    %4 = vector.shape_cast %3 : vector<128xf32> to vector<1x128xf32>
    %5 = vector.extract_strided_slice %1 {offsets = [0, 0], sizes = [1, 128], strides = [1, 1]} : vector<5x128xf32> to vector<1x128xf32>
    %6 = vector.shape_cast %5 : vector<1x128xf32> to vector<128xf32>
    %7 = vector.shape_cast %6 : vector<128xf32> to vector<1x128xf32>
    %8 = vector.broadcast %0 : vector<8x1xf32> to vector<8x128xf32>
    %9 = vector.broadcast %7 : vector<1x128xf32> to vector<8x128xf32>
    %10 = arith.mulf %8, %9 : vector<8x128xf32>
    %11 = vector.broadcast %4 : vector<1x128xf32> to vector<8x128xf32>
    %12 = arith.addf %11, %10 : vector<8x128xf32>
    %13 = math.tanh %12 : vector<8x128xf32>
    %c0_3 = arith.constant 0 : index
    %c0_4 = arith.constant 0 : index
    %c0_5 = arith.constant 0 : index
    %14 = vector.load %arg2[%c0_3, %c0_4, %c0_5] : memref<2x128x128xf32, #tpu.memory_space<vmem>>, vector<1x128x128xf32>
    %15 = vector.shape_cast %14 : vector<1x128x128xf32> to vector<128x128xf32>
    %cst = arith.constant dense<0.000000e+00> : vector<8x128xf32>
    %16 = tpu.matmul %13, %15, %cst {dimension_numbers = #tpu.dot_dimension_numbers<[1], [0], [0], [1], [0, 0, 1, 1], [], []>} : vector<8x128xf32>, vector<128x128xf32>, vector<8x128xf32> -> vector<8x128xf32>
    %17 = vector.extract_strided_slice %1 {offsets = [2, 0], sizes = [1, 128], strides = [1, 1]} : vector<5x128xf32> to vector<1x128xf32>
    %18 = vector.shape_cast %17 : vector<1x128xf32> to vector<128xf32>
    %19 = vector.shape_cast %18 : vector<128xf32> to vector<1x128xf32>
    %20 = vector.broadcast %19 : vector<1x128xf32> to vector<8x128xf32>
    %21 = arith.addf %16, %20 : vector<8x128xf32>
    %22 = math.tanh %21 : vector<8x128xf32>
    %c1 = arith.constant 1 : index
    %c0_6 = arith.constant 0 : index
    %c0_7 = arith.constant 0 : index
    %23 = vector.load %arg2[%c1, %c0_6, %c0_7] : memref<2x128x128xf32, #tpu.memory_space<vmem>>, vector<1x128x128xf32>
    %24 = vector.shape_cast %23 : vector<1x128x128xf32> to vector<128x128xf32>
    %cst_8 = arith.constant dense<0.000000e+00> : vector<8x128xf32>
    %25 = tpu.matmul %22, %24, %cst_8 {dimension_numbers = #tpu.dot_dimension_numbers<[1], [0], [0], [1], [0, 0, 1, 1], [], []>} : vector<8x128xf32>, vector<128x128xf32>, vector<8x128xf32> -> vector<8x128xf32>
    %26 = vector.extract_strided_slice %1 {offsets = [3, 0], sizes = [1, 128], strides = [1, 1]} : vector<5x128xf32> to vector<1x128xf32>
    %27 = vector.shape_cast %26 : vector<1x128xf32> to vector<128xf32>
    %28 = vector.shape_cast %27 : vector<128xf32> to vector<1x128xf32>
    %29 = vector.broadcast %28 : vector<1x128xf32> to vector<8x128xf32>
    %30 = arith.addf %25, %29 : vector<8x128xf32>
    %31 = math.tanh %30 : vector<8x128xf32>
    %c0_9 = arith.constant 0 : index
    %c0_10 = arith.constant 0 : index
    %32 = vector.load %arg3[%c0_9, %c0_10] : memref<128x128xf32, #tpu.memory_space<vmem>>, vector<128x128xf32>
    %cst_11 = arith.constant dense<0.000000e+00> : vector<8x128xf32>
    %33 = tpu.matmul %31, %32, %cst_11 {dimension_numbers = #tpu.dot_dimension_numbers<[1], [0], [0], [1], [0, 0, 1, 1], [], []>} : vector<8x128xf32>, vector<128x128xf32>, vector<8x128xf32> -> vector<8x128xf32>
    %34 = vector.extract_strided_slice %1 {offsets = [4, 0], sizes = [1, 128], strides = [1, 1]} : vector<5x128xf32> to vector<1x128xf32>
    %35 = vector.shape_cast %34 : vector<1x128xf32> to vector<128xf32>
    %36 = vector.shape_cast %35 : vector<128xf32> to vector<1x128xf32>
    %37 = vector.broadcast %36 : vector<1x128xf32> to vector<8x128xf32>
    %38 = arith.addf %33, %37 : vector<8x128xf32>
    %c0_12 = arith.constant 0 : index
    %c0_13 = arith.constant 0 : index
    %39 = vector.load %arg5[%c0_12, %c0_13] : memref<8x128xf32, #tpu.memory_space<vmem>>, vector<8x128xf32>
    tpu.vector_store %arg5[%c0_12, %c0_13], %38 {strides = array<i32>} : memref<8x128xf32, #tpu.memory_space<vmem>>, vector<8x128xf32>,
    return
  }
  func.func @transform_0(%arg0: i32) -> (i32, i32) {
    %c0_i32 = arith.constant 0 : i32
    %c0_i32_0 = arith.constant 0 : i32
    return %arg0, %c0_i32 : i32, i32
  }
  func.func @transform_1(%arg0: i32) -> (i32, i32, i32) {
    %c0_i32 = arith.constant 0 : i32
    %c0_i32_0 = arith.constant 0 : i32
    %c0_i32_1 = arith.constant 0 : i32
    %c0_i32_2 = arith.constant 0 : i32
    return %c0_i32, %c0_i32_0, %c0_i32_1 : i32, i32, i32
  }
  func.func @transform_2(%arg0: i32) -> (i32, i32) {
    %c0_i32 = arith.constant 0 : i32
    %c0_i32_0 = arith.constant 0 : i32
    %c0_i32_1 = arith.constant 0 : i32
    return %c0_i32, %c0_i32_0 : i32, i32
  }
  func.func @transform_3(%arg0: i32) -> (i32, i32) {
    %c0_i32 = arith.constant 0 : i32
    %c0_i32_0 = arith.constant 0 : i32
    %c0_i32_1 = arith.constant 0 : i32
    return %c0_i32, %c0_i32_0 : i32, i32
  }
  func.func @transform_4(%arg0: i32) -> (i32, i32) {
    %c0_i32 = arith.constant 0 : i32
    %c0_i32_0 = arith.constant 0 : i32
    return %arg0, %c0_i32 : i32, i32
  }
}

module attributes {stable_mosaic.version = 11 : i64} {
  func.func @kernel(%arg0: i32, %arg1: memref<8x1xf32, #tpu.memory_space<vmem>>, %arg2: memref<2x128x128xf32, #tpu.memory_space<vmem>>, %arg3: memref<128x128xf32, #tpu.memory_space<vmem>>, %arg4: memref<5x128xf32, #tpu.memory_space<vmem>>, %arg5: memref<8x128xf32, #tpu.memory_space<vmem>>) attributes {dimension_semantics = [#tpu.dimension_semantics<parallel>], iteration_bounds = array<i64: 1>, scalar_prefetch = 0 : i64, scratch_operands = 0 : i64, tpu.core_type = #tpu.core_type<tc>, window_params = [{transform_indices = @transform_0, window_bounds = array<i64: 8, 1>}, {pipeline_mode = #tpu.pipeline_mode<synchronous>, transform_indices = @transform_1, window_bounds = array<i64: 2, 128, 128>}, {pipeline_mode = #tpu.pipeline_mode<synchronous>, transform_indices = @transform_2, window_bounds = array<i64: 128, 128>}, {pipeline_mode = #tpu.pipeline_mode<synchronous>, transform_indices = @transform_3, window_bounds = array<i64: 5, 128>}, {transform_indices = @transform_4, window_bounds = array<i64: 8, 128>}]} {
    %c0 = arith.constant 0 : index
    %c0_0 = arith.constant 0 : index
    %0 = vector.load %arg1[%c0, %c0_0] : memref<8x1xf32, #tpu.memory_space<vmem>>, vector<8x1xf32>
    %c0_1 = arith.constant 0 : index
    %c0_2 = arith.constant 0 : index
    %1 = vector.load %arg4[%c0_1, %c0_2] : memref<5x128xf32, #tpu.memory_space<vmem>>, vector<5x128xf32>
    %2 = vector.extract_strided_slice %1 {offsets = [1, 0], sizes = [1, 128], strides = [1, 1]} : vector<5x128xf32> to vector<1x128xf32>
    %3 = vector.shape_cast %2 : vector<1x128xf32> to vector<128xf32>
    %4 = vector.shape_cast %3 : vector<128xf32> to vector<1x128xf32>
    %5 = vector.extract_strided_slice %1 {offsets = [0, 0], sizes = [1, 128], strides = [1, 1]} : vector<5x128xf32> to vector<1x128xf32>
    %6 = vector.shape_cast %5 : vector<1x128xf32> to vector<128xf32>
    %7 = vector.shape_cast %6 : vector<128xf32> to vector<1x128xf32>
    %8 = vector.broadcast %0 : vector<8x1xf32> to vector<8x128xf32>
    %9 = vector.broadcast %7 : vector<1x128xf32> to vector<8x128xf32>
    %10 = arith.mulf %8, %9 : vector<8x128xf32>
    %11 = vector.broadcast %4 : vector<1x128xf32> to vector<8x128xf32>
    %12 = arith.addf %11, %10 : vector<8x128xf32>
    %13 = math.tanh %12 : vector<8x128xf32>
    %c0_3 = arith.constant 0 : index
    %c0_4 = arith.constant 0 : index
    %c0_5 = arith.constant 0 : index
    %14 = vector.load %arg2[%c0_3, %c0_4, %c0_5] : memref<2x128x128xf32, #tpu.memory_space<vmem>>, vector<1x128x128xf32>
    %15 = vector.shape_cast %14 : vector<1x128x128xf32> to vector<128x128xf32>
    %cst = arith.constant dense<0.000000e+00> : vector<8x128xf32>
    %16 = tpu.matmul %13, %15, %cst {dimension_numbers = #tpu.dot_dimension_numbers<[1], [0], [0], [1], [0, 0, 1, 1], [], []>} : vector<8x128xf32>, vector<128x128xf32>, vector<8x128xf32> -> vector<8x128xf32>
    %17 = vector.extract_strided_slice %1 {offsets = [2, 0], sizes = [1, 128], strides = [1, 1]} : vector<5x128xf32> to vector<1x128xf32>
    %18 = vector.shape_cast %17 : vector<1x128xf32> to vector<128xf32>
    %19 = vector.shape_cast %18 : vector<128xf32> to vector<1x128xf32>
    %20 = vector.broadcast %19 : vector<1x128xf32> to vector<8x128xf32>
    %21 = arith.addf %16, %20 : vector<8x128xf32>
    %22 = math.tanh %21 : vector<8x128xf32>
    %c1 = arith.constant 1 : index
    %c0_6 = arith.constant 0 : index
    %c0_7 = arith.constant 0 : index
    %23 = vector.load %arg2[%c1, %c0_6, %c0_7] : memref<2x128x128xf32, #tpu.memory_space<vmem>>, vector<1x128x128xf32>
    %24 = vector.shape_cast %23 : vector<1x128x128xf32> to vector<128x128xf32>
    %cst_8 = arith.constant dense<0.000000e+00> : vector<8x128xf32>
    %25 = tpu.matmul %22, %24, %cst_8 {dimension_numbers = #tpu.dot_dimension_numbers<[1], [0], [0], [1], [0, 0, 1, 1], [], []>} : vector<8x128xf32>, vector<128x128xf32>, vector<8x128xf32> -> vector<8x128xf32>
    %26 = vector.extract_strided_slice %1 {offsets = [3, 0], sizes = [1, 128], strides = [1, 1]} : vector<5x128xf32> to vector<1x128xf32>
    %27 = vector.shape_cast %26 : vector<1x128xf32> to vector<128xf32>
    %28 = vector.shape_cast %27 : vector<128xf32> to vector<1x128xf32>
    %29 = vector.broadcast %28 : vector<1x128xf32> to vector<8x128xf32>
    %30 = arith.addf %25, %29 : vector<8x128xf32>
    %31 = math.tanh %30 : vector<8x128xf32>
    %c0_9 = arith.constant 0 : index
    %c0_10 = arith.constant 0 : index
    %32 = vector.load %arg3[%c0_9, %c0_10] : memref<128x128xf32, #tpu.memory_space<vmem>>, vector<128x128xf32>
    %cst_11 = arith.constant dense<0.000000e+00> : vector<8x128xf32>
    %33 = tpu.matmul %31, %32, %cst_11 {dimension_numbers = #tpu.dot_dimension_numbers<[1], [0], [0], [1], [0, 0, 1, 1], [], []>} : vector<8x128xf32>, vector<128x128xf32>, vector<8x128xf32> -> vector<8x128xf32>
    %34 = vector.extract_strided_slice %1 {offsets = [4, 0], sizes = [1, 128], strides = [1, 1]} : vector<5x128xf32> to vector<1x128xf32>
    %35 = vector.shape_cast %34 : vector<1x128xf32> to vector<128xf32>
    %36 = vector.shape_cast %35 : vector<128xf32> to vector<1x128xf32>
    %37 = vector.broadcast %36 : vector<1x128xf32> to vector<8x128xf32>
    %38 = arith.addf %33, %37 : vector<8x128xf32>
    %c0_12 = arith.constant 0 : index
    %c0_13 = arith.constant 0 : index
    %39 = vector.load %arg5[%c0_12, %c0_13] : memref<8x128xf32, #tpu.memory_space<vmem>>, vector<8x128xf32>
    tpu.vector_store %arg5[%c0_12, %c0_13], %38 {strides = array<i32>} : memref<8x128xf32, #tpu.memory_space<vmem>>, vector<8x128xf32>,
    return
  }
  func.func @transform_0(%arg0: i32) -> (i32, i32) {
    %c0_i32 = arith.constant 0 : i32
    %c0_i32_0 = arith.constant 0 : i32
    return %arg0, %c0_i32 : i32, i32
  }
  func.func @transform_1(%arg0: i32) -> (i32, i32, i32) {
    %c0_i32 = arith.constant 0 : i32
    %c0_i32_0 = arith.constant 0 : i32
    %c0_i32_1 = arith.constant 0 : i32
    %c0_i32_2 = arith.constant 0 : i32
    return %c0_i32, %c0_i32_0, %c0_i32_1 : i32, i32, i32
  }
  func.func @transform_2(%arg0: i32) -> (i32, i32) {
    %c0_i32 = arith.constant 0 : i32
    %c0_i32_0 = arith.constant 0 : i32
    %c0_i32_1 = arith.constant 0 : i32
    return %c0_i32, %c0_i32_0 : i32, i32
  }
  func.func @transform_3(%arg0: i32) -> (i32, i32) {
    %c0_i32 = arith.constant 0 : i32
    %c0_i32_0 = arith.constant 0 : i32
    %c0_i32_1 = arith.constant 0 : i32
    return %c0_i32, %c0_i32_0 : i32, i32
  }
  func.func @transform_4(%arg0: i32) -> (i32, i32) {
    %c0_i32 = arith.constant 0 : i32
    %c0_i32_0 = arith.constant 0 : i32
    return %arg0, %c0_i32 : i32, i32
  }
}

</mosaic_0001>

<bundles_post_ra>
// kernel: tpu_custom_call.1
= control target key start
LH: loop header
LB: loop body
LE: loop exit
PB: predicated region body
PF: predicated region fallthrough
CT: control target
= control target key end

     0   :  { %9 = vsyncpa [#allocation3], 0  ;;  %s790_s0 = inlined_call_operand.vmem [shape: f32[8,1], index: 0, kind: input, shape index: {}]   ;;  %s791_s1 = inlined_call_operand.hbm [shape: f32[2,128,128], index: 1, kind: input, shape index: {}]   ;;  %s792_s2 = inlined_call_operand.hbm [shape: f32[128,128], index: 2, kind: input, shape index: {}]   ;;  %s793_s3 = inlined_call_operand.vmem [shape: f32[5,128], index: 3, kind: input, shape index: {}]   ;;  %s794_s4 = inlined_call_operand.hbm [shape: f32[8,128], index: 4, kind: output, shape index: {}]  }
   0x1   :  { %10 = vsyncpa [#allocation6], 0 }
   0x2   :  { %11 = vsyncpa [#allocation4], 0  ;;  %s670_s15 = smov [#allocation2]   ;;  %s598_s19 = scalar_lea.hbm %s791_s1, 4096 }
   0x3   :  { %s19_s16 = sshll.u32 %s670_s15, 4  ;;  %p599_p0 = scmp.ne.s32.totalorder %s791_s1, %s598_s19  ;;  %s20_s16 = int_to_ptr.vmem [resolvable:$true] %s19_s16 }
   0x4   :  { %p602_p1 = scmp.lt.u32.totalorder %s598_s19, %s791_s1 }
   0x6   :  { %p604_p2 = pnand %p602_p1, %p599_p0 }
   0x8   :  { %607 = shalt.err (!%p604_p2)
}
   0x9   :  { %s608_s24 = scalar_lea.vmem %s20_s16, 4096  ;;  %p613_p4 = scmp.lt.s32.totalorder %s20_s16, %s20_s16 }
   0xa   :  { %p609_p3 = scmp.ne.s32.totalorder %s20_s16, %s608_s24  ;;  %p614_p5 = scmp.lt.s32.totalorder %s608_s24, %s608_s24 }
   0xc   :  { %p615_p6 = por %p614_p5, %p613_p4 }
   0xe   :  { %p616_p7 = pnand %p615_p6, %p609_p3 }
  0x10   :  { %619 = shalt.err (!%p616_p7)
}
  0x11   :  { %s671_s25 = smov 128   ;;  %s672_s26 = smov 8  }
  0x12   :  { %25 = dma.hbm_to_vmem [thread:$0]  %s791_s1, 4096, %s20_s16, [#allocation3], %s671_s25, %s671_s25, %s672_s26  }
  0x13   :  { %s673_s29 = smov [#allocation5]   ;;  %s620_s7 = scalar_lea.hbm %s792_s2, 2048 }
  0x14   :  { %s31_s30 = sshll.u32 %s673_s29, 4  ;;  %p621_p8 = scmp.ne.s32.totalorder %s792_s2, %s620_s7  ;;  %s32_s30 = int_to_ptr.vmem [resolvable:$true] %s31_s30 }
  0x15   :  { %p624_p9 = scmp.lt.u32.totalorder %s620_s7, %s792_s2 }
  0x17   :  { %p626_p10 = pnand %p624_p9, %p621_p8 }
  0x19   :  { %629 = shalt.err (!%p626_p10)
}
  0x1a   :  { %s630_s12 = scalar_lea.vmem %s32_s30, 2048  ;;  %p635_p12 = scmp.lt.s32.totalorder %s32_s30, %s32_s30 }
  0x1b   :  { %p631_p11 = scmp.ne.s32.totalorder %s32_s30, %s630_s12  ;;  %p636_p13 = scmp.lt.s32.totalorder %s630_s12, %s630_s12 }
  0x1d   :  { %p637_p0 = por %p636_p13, %p635_p12 }
  0x1f   :  { %p638_p1 = pnand %p637_p0, %p631_p11 }
  0x21   :  { %641 = shalt.err (!%p638_p1)
}
  0x22   :  { %37 = dma.hbm_to_vmem [thread:$0]  %s792_s2, 2048, %s32_s30, [#allocation6], %s671_s25, %s671_s25, %s672_s26  }
  0x23   :  { %664 = dma.done.wait [#allocation3], 4096  }
  0x24   :  { %665 = vsyncadd [#allocation3], 4294963200 }
  0x25   :  { %666 = dma.done.wait [#allocation6], 2048  }
  0x26   :  { %667 = vsyncadd [#allocation6], 4294965248  ;;  %v674_v0 = vmov 0   ;;  %v675_v1 = vmov 0.0|0.0   ;;  %v46_v2 = vld [vmem:[%s790_s0] sm:$0xff]  ;;  %v64_v3 = vld [vmem:[#allocation2] sm:$0xff]  ;;  %v53_v43 = vlaneseq }
  0x27   :  { %591 = vset.pattern.permute.xlu0 %v674_v0  ;;  %510 = vmatprep.subr.bf16.mxu0 %v675_v1  ;;  %v65_v4 = vld [vmem:[#allocation2 + $0x8] sm:$0xff]  ;;  %v66_v6 = vld [vmem:[#allocation2 + $0x10] sm:$0xff]  ;;  %v67_v7 = vld [vmem:[#allocation2 + $0x18] sm:$0xff]  ;;  %vm676_vm0 = vmmov 0   ;;  %v677_v11 = vmov 0.0  }
  0x28   :  { %534 = vmatprep.subr.bf16.mxu1 %v675_v1  ;;  %50 = vperm.xlu0 %591, %v46_v2   ;;  %v511_v5 = vpack.c.bf16 %v65_v4, %v64_v3  ;;  %v514_v8 = vpack.c.bf16 %v67_v7, %v66_v6  ;;  %v68_v9 = vld [vmem:[#allocation2 + $0x20] sm:$0xff]  ;;  %v69_v10 = vld [vmem:[#allocation2 + $0x28] sm:$0xff]  ;;  %v70_v13 = vld [vmem:[#allocation2 + $0x30] sm:$0xff]  ;;  %v750_v44 = vshrl.u32 %v53_v43, 7 }
  0x29   :  { %437 = vmatprep.mubr.msk.f32.mxu0 %vm676_vm0, %v677_v11  ;;  %472 = vmatprep.mubr.msk.f32.mxu1 %vm676_vm0, %v677_v11  ;;  %v517_v12 = vpack.c.bf16 %v69_v10, %v68_v9  ;;  %v71_v14 = vld [vmem:[#allocation2 + $0x38] sm:$0xff]  ;;  %v72_v16 = vld [vmem:[#allocation2 + $0x40] sm:$0xff]  ;;  %v73_v17 = vld [vmem:[#allocation2 + $0x48] sm:$0xff] }
  0x2a   :  { %512 = vmatpush3.bf16.msra.mxu0 %v511_v5  ;;  %v520_v15 = vpack.c.bf16 %v71_v14, %v70_v13  ;;  %v523_v18 = vpack.c.bf16 %v73_v17, %v72_v16  ;;  %v74_v19 = vld [vmem:[#allocation2 + $0x50] sm:$0xff]  ;;  %v75_v20 = vld [vmem:[#allocation2 + $0x58] sm:$0xff]  ;;  %v156_v21 = vld [vmem:[#allocation2 + $0x80] sm:$0xff]  ;;  %v55_v45 = vsub.s32 0, %v750_v44  ;;  %v60_v47 = vsub.s32 1, %v750_v44 }
  0x2b   :  { %513 = vmatprep.subr.bf16.mxu0 %v675_v1  ;;  %v157_v22 = vld [vmem:[#allocation2 + $0x88] sm:$0xff]  ;;  %v158_v23 = vld [vmem:[#allocation2 + $0x90] sm:$0xff]  ;;  %v159_v25 = vld [vmem:[#allocation2 + $0x98] sm:$0xff]  ;;  %v526_v26 = vpack.c.bf16 %v75_v20, %v74_v19 }
  0x2c   :  { %v535_v24 = vpack.c.bf16 %v157_v22, %v156_v21  ;;  %v76_v27 = vld [vmem:[#allocation2 + $0x60] sm:$0xff]  ;;  %v538_v28 = vpack.c.bf16 %v159_v25, %v158_v23  ;;  %v77_v29 = vld [vmem:[#allocation2 + $0x68] sm:$0xff]  ;;  %v78_v33 = vld [vmem:[#allocation2 + $0x70] sm:$0xff] }
  0x2d   :  { %v160_v30 = vld [vmem:[#allocation2 + $0xa0] sm:$0xff]  ;;  %v161_v31 = vld [vmem:[#allocation2 + $0xa8] sm:$0xff]  ;;  %v529_v32 = vpack.c.bf16 %v77_v29, %v76_v27  ;;  %v79_v35 = vld [vmem:[#allocation2 + $0x78] sm:$0xff] }
  0x2e   :  { %515 = vmatpush3.bf16.msra.mxu0 %v514_v8  ;;  %536 = vmatpush3.bf16.msra.mxu1 %v535_v24  ;;  %v541_v34 = vpack.c.bf16 %v161_v31, %v160_v30  ;;  %v162_v36 = vld [vmem:[#allocation2 + $0xb0] sm:$0xff]  ;;  %v163_v37 = vld [vmem:[#allocation2 + $0xb8] sm:$0xff]  ;;  %v532_v38 = vpack.c.bf16 %v79_v35, %v78_v33  ;;  %v164_v40 = vld [vmem:[#allocation2 + $0xc0] sm:$0xff]  ;;  %v174_v30 = vsub.s32 3, %v750_v44 }
  0x2f   :  { %516 = vmatprep.subr.bf16.mxu0 %v675_v1  ;;  %537 = vmatprep.subr.bf16.mxu1 %v675_v1  ;;  %v544_v39 = vpack.c.bf16 %v163_v37, %v162_v36  ;;  %v165_v41 = vld [vmem:[#allocation2 + $0xc8] sm:$0xff]  ;;  %v756_v46 = vld [vmem:[%s793_s3] sm:$0x1f]  ;;  %v167_v55 = vld [vmem:[#allocation2 + $0xd8] sm:$0xff]  ;;  %v265_v36 = vsub.s32 4, %v750_v44  ;;  %s678_s3 = smov [#allocation7]  }
  0x30   :  { %v547_v42 = vpack.c.bf16 %v165_v41, %v164_v40  ;;  %v56_v48 = vrot.slane %v756_v46, %v55_v45  ;;  %v61_v49 = vrot.slane %v756_v46, %v60_v47  ;;  %v166_v54 = vld [vmem:[#allocation2 + $0xd0] sm:$0xff]  ;;  %v168_v57 = vld [vmem:[#allocation2 + $0xe0] sm:$0xff]  ;;  %v169_v58 = vld [vmem:[#allocation2 + $0xe8] sm:$0xff]  ;;  %v175_v31 = vrot.slane %v756_v46, %v174_v30  ;;  %s344_s16 = sshll.u32 %s678_s3, 4  ;;  %s345_s16 = int_to_ptr.vmem [resolvable:$true] %s344_s16 }
  0x31   :  { %v550_v56 = vpack.c.bf16 %v167_v55, %v166_v54  ;;  %v553_v59 = vpack.c.bf16 %v169_v58, %v168_v57  ;;  %v170_v60 = vld [vmem:[#allocation2 + $0xf0] sm:$0xff]  ;;  %v171_v61 = vld [vmem:[#allocation2 + $0xf8] sm:$0xff]  ;;  %v247_v63 = vld [vmem:[#allocation5] sm:$0xff]  ;;  %v266_v37 = vrot.slane %v756_v46, %v265_v36  ;;  %s642_s17 = scalar_lea.vmem %s345_s16, 128  ;;  %p647_p3 = scmp.lt.s32.totalorder %s345_s16, %s345_s16 }
  0x32   :  { %518 = vmatpush3.bf16.msra.mxu0 %v517_v12  ;;  %539 = vmatpush3.bf16.msra.mxu1 %v538_v28  ;;  %v556_v62 = vpack.c.bf16 %v171_v61, %v170_v60  ;;  %v248_v0 = vld [vmem:[#allocation5 + $0x8] sm:$0xff]  ;;  %v249_v2 = vld [vmem:[#allocation5 + $0x10] sm:$0xff]  ;;  %v250_v4 = vld [vmem:[#allocation5 + $0x18] sm:$0xff]  ;;  %p643_p2 = scmp.ne.s32.totalorder %s345_s16, %s642_s17  ;;  %p648_p4 = scmp.lt.s32.totalorder %s642_s17, %s642_s17 }
  0x33   :  { %519 = vmatprep.subr.bf16.mxu0 %v675_v1  ;;  %540 = vmatprep.subr.bf16.mxu1 %v675_v1  ;;  %v559_v3 = vpack.c.bf16 %v248_v0, %v247_v63  ;;  %v562_v5 = vpack.c.bf16 %v250_v4, %v249_v2  ;;  %v251_v6 = vld [vmem:[#allocation5 + $0x20] sm:$0xff]  ;;  %v252_v7 = vld [vmem:[#allocation5 + $0x28] sm:$0xff]  ;;  %v253_v9 = vld [vmem:[#allocation5 + $0x30] sm:$0xff] }
  0x34   :  { %v565_v8 = vpack.c.bf16 %v252_v7, %v251_v6  ;;  %v254_v10 = vld [vmem:[#allocation5 + $0x38] sm:$0xff]  ;;  %v255_v12 = vld [vmem:[#allocation5 + $0x40] sm:$0xff]  ;;  %v256_v13 = vld [vmem:[#allocation5 + $0x48] sm:$0xff]  ;;  %p649_p5 = por %p648_p4, %p647_p3 }
  0x35   :  { %v571_v14 = vpack.c.bf16 %v256_v13, %v255_v12  ;;  %v257_v21 = vld [vmem:[#allocation5 + $0x50] sm:$0xff]  ;;  %v258_v22 = vld [vmem:[#allocation5 + $0x58] sm:$0xff]  ;;  %v259_v24 = vld [vmem:[#allocation5 + $0x60] sm:$0xff] }
  0x36   :  { %521 = vmatpush3.bf16.msra.mxu0 %v520_v15  ;;  %542 = vmatpush3.bf16.msra.mxu1 %v541_v34  ;;  %v82_v15 = vsub.s32 2, %v750_v44  ;;  %v574_v23 = vpack.c.bf16 %v258_v22, %v257_v21  ;;  %v260_v25 = vld [vmem:[#allocation5 + $0x68] sm:$0xff]  ;;  %v261_v27 = vld [vmem:[#allocation5 + $0x70] sm:$0xff]  ;;  %v262_v28 = vld [vmem:[#allocation5 + $0x78] sm:$0xff]  ;;  %p650_p6 = pnand %p649_p5, %p643_p2 }
  0x37   :  { %522 = vmatprep.subr.bf16.mxu0 %v675_v1  ;;  %543 = vmatprep.subr.bf16.mxu1 %v675_v1  ;;  %v580_v29 = vpack.c.bf16 %v262_v28, %v261_v27 }
  0x38   :  { %v83_v16 = vrot.slane %v756_v46, %v82_v15 }
  0x3a   :  { %524 = vmatpush3.bf16.msra.mxu0 %v523_v18  ;;  %545 = vmatpush3.bf16.msra.mxu1 %v544_v39 }
  0x3b   :  { %525 = vmatprep.subr.bf16.mxu0 %v675_v1  ;;  %546 = vmatprep.subr.bf16.mxu1 %v675_v1 }
  0x3e   :  { %527 = vmatpush3.bf16.msra.mxu0 %v526_v26  ;;  %548 = vmatpush3.bf16.msra.mxu1 %v547_v42  ;;  %v577_v26 = vpack.c.bf16 %v260_v25, %v259_v24 }
  0x3f   :  { %528 = vmatprep.subr.bf16.mxu0 %v675_v1  ;;  %549 = vmatprep.subr.bf16.mxu1 %v675_v1 }
  0x42   :  { %530 = vmatpush3.bf16.msra.mxu0 %v529_v32  ;;  %551 = vmatpush3.bf16.msra.mxu1 %v550_v56 }
  0x43   :  { %531 = vmatprep.subr.bf16.mxu0 %v675_v1  ;;  %552 = vmatprep.subr.bf16.mxu1 %v675_v1 }
  0x46   :  { %533 = vmatpush3.bf16.msra.mxu0 %v532_v38  ;;  %554 = vmatpush3.bf16.msra.mxu1 %v553_v59 }
  0x47   :  { %558 = vmatprep.subr.bf16.mxu0 %v675_v1  ;;  %555 = vmatprep.subr.bf16.mxu1 %v675_v1 }
  0x4a   :  { %557 = vmatpush3.bf16.msra.mxu1 %v556_v62 }
  0xa7   :  { %v51_v50 = vpop.permute.xlu0 %50 }
  0xa8   :  { %v57_v51 = vmul.f32 %v56_v48, %v51_v50 }
  0xaa   :  { %v62_v52 = vadd.f32 %v61_v49, %v57_v51 }
  0xac   :  { %592 = vtanh.f32 %v62_v52 }
  0xb6   :  { %v593_v53 = vpop.eup %592 }
  0xb7   :  { %438 = vmatmul.mubr.f32.vlgmr.msra.gmra.mrb[0].mxu0 %v593_v53 }
  0xb8   :  { %507 = vmatprep.mubr.msk.f32.mxu0 %vm676_vm0, %v677_v11  ;;  %560 = vmatpush3.bf16.msra.mxu0 %v559_v3  ;;  %v568_v11 = vpack.c.bf16 %v254_v10, %v253_v9 }
  0xb9   :  { %561 = vmatprep.subr.bf16.mxu0 %v675_v1 }
  0xbc   :  { %563 = vmatpush3.bf16.msra.mxu0 %v562_v5 }
  0xbd   :  { %564 = vmatprep.subr.bf16.mxu0 %v675_v1 }
  0xc0   :  { %566 = vmatpush3.bf16.msra.mxu0 %v565_v8 }
  0xc1   :  { %567 = vmatprep.subr.bf16.mxu0 %v675_v1 }
  0xc4   :  { %569 = vmatpush3.bf16.msra.mxu0 %v568_v11 }
  0xc5   :  { %570 = vmatprep.subr.bf16.mxu0 %v675_v1 }
  0xc8   :  { %572 = vmatpush3.bf16.msra.mxu0 %v571_v14 }
  0xc9   :  { %573 = vmatprep.subr.bf16.mxu0 %v675_v1 }
  0xcc   :  { %575 = vmatpush3.bf16.msra.mxu0 %v574_v23 }
  0xcd   :  { %576 = vmatprep.subr.bf16.mxu0 %v675_v1 }
  0xd0   :  { %578 = vmatpush3.bf16.msra.mxu0 %v577_v26 }
  0xd1   :  { %579 = vmatprep.subr.bf16.mxu0 %v675_v1 }
  0xd4   :  { %581 = vmatpush3.bf16.msra.mxu0 %v580_v29 }
 0x18a   :  { %v150_v17 = vpop.f32.mrb[0].mxu0 }
 0x18b   :  { %v151_v18 = vadd.f32 %v150_v17, %v83_v16  ;;  %v439_v19 = vpop.f32.mrb[1].mxu0 }
 0x18d   :  { %594 = vtanh.f32 %v151_v18 }
 0x197   :  { %v595_v20 = vpop.eup %594 }
 0x198   :  { %473 = vmatmul.mubr.f32.vlgmr.msra.gmra.mrb[0].mxu1 %v595_v20 }
 0x26b   :  { %v242_v32 = vpop.f32.mrb[0].mxu1 }
 0x26c   :  { %v243_v33 = vadd.f32 %v242_v32, %v175_v31  ;;  %v474_v34 = vpop.f32.mrb[1].mxu1 }
 0x26e   :  { %596 = vtanh.f32 %v243_v33 }
 0x278   :  { %v597_v35 = vpop.eup %596 }
 0x279   :  { %508 = vmatmul.mubr.f32.vlgmr.msra.gmra.mrb[2].mxu0 %v597_v35 }
 0x34c   :  { %v333_v38 = vpop.f32.mrb[2].mxu0 }
 0x34d   :  { %v334_v39 = vadd.f32 %v333_v38, %v266_v37  ;;  %v509_v1 = vpop.f32.mrb[3].mxu0 }
 0x34f   :  { %337 = vst [vmem:[#allocation7] sm:$0xff] %v334_v39 }
 0x350   :  { %653 = shalt.err (!%p650_p6)
}
 0x351   :  { %s654_s20 = scalar_lea.hbm %s794_s4, 128 }
 0x352   :  { %p655_p7 = scmp.ne.s32.totalorder %s794_s4, %s654_s20  ;;  %p658_p8 = scmp.lt.u32.totalorder %s654_s20, %s794_s4 }
 0x354   :  { %p660_p9 = pnand %p658_p8, %p655_p7 }
 0x356   :  { %663 = shalt.err (!%p660_p9)
}
 0x357   :  { %347 = dma.vmem_to_hbm [thread:$0]  %s345_s16, 128, %s794_s4, [#allocation4]  }
 0x358   :  { %668 = dma.done.wait [#allocation4], 128  }
 0x359   :  { %669 = vsyncadd [#allocation4], 4294967168 }
 0x35a   :  { %351 = vsyncpa [#allocation3], 1 }
 0x35b   :  { %352 = vsyncpa [#allocation6], 1 }
 0x35c   :  { %353 = vsyncpa [#allocation4], 1 }

// kernel: tpu_custom_call.1
= control target key start
LH: loop header
LB: loop body
LE: loop exit
PB: predicated region body
PF: predicated region fallthrough
CT: control target
= control target key end

     0   :  { %9 = vsyncpa [#allocation3], 0  ;;  %s790_s0 = inlined_call_operand.vmem [shape: f32[8,1], index: 0, kind: input, shape index: {}]   ;;  %s791_s1 = inlined_call_operand.hbm [shape: f32[2,128,128], index: 1, kind: input, shape index: {}]   ;;  %s792_s2 = inlined_call_operand.hbm [shape: f32[128,128], index: 2, kind: input, shape index: {}]   ;;  %s793_s3 = inlined_call_operand.vmem [shape: f32[5,128], index: 3, kind: input, shape index: {}]   ;;  %s794_s4 = inlined_call_operand.hbm [shape: f32[8,128], index: 4, kind: output, shape index: {}]  }
   0x1   :  { %10 = vsyncpa [#allocation6], 0 }
   0x2   :  { %11 = vsyncpa [#allocation4], 0  ;;  %s670_s15 = smov [#allocation2]   ;;  %s598_s19 = scalar_lea.hbm %s791_s1, 4096 }
   0x3   :  { %s19_s16 = sshll.u32 %s670_s15, 4  ;;  %p599_p0 = scmp.ne.s32.totalorder %s791_s1, %s598_s19  ;;  %s20_s16 = int_to_ptr.vmem [resolvable:$true] %s19_s16 }
   0x4   :  { %p602_p1 = scmp.lt.u32.totalorder %s598_s19, %s791_s1 }
   0x6   :  { %p604_p2 = pnand %p602_p1, %p599_p0 }
   0x8   :  { %607 = shalt.err (!%p604_p2)
}
   0x9   :  { %s608_s24 = scalar_lea.vmem %s20_s16, 4096  ;;  %p613_p4 = scmp.lt.s32.totalorder %s20_s16, %s20_s16 }
   0xa   :  { %p609_p3 = scmp.ne.s32.totalorder %s20_s16, %s608_s24  ;;  %p614_p5 = scmp.lt.s32.totalorder %s608_s24, %s608_s24 }
   0xc   :  { %p615_p6 = por %p614_p5, %p613_p4 }
   0xe   :  { %p616_p7 = pnand %p615_p6, %p609_p3 }
  0x10   :  { %619 = shalt.err (!%p616_p7)
}
  0x11   :  { %s671_s25 = smov 128   ;;  %s672_s26 = smov 8  }
  0x12   :  { %25 = dma.hbm_to_vmem [thread:$0]  %s791_s1, 4096, %s20_s16, [#allocation3], %s671_s25, %s671_s25, %s672_s26  }
  0x13   :  { %s673_s29 = smov [#allocation5]   ;;  %s620_s7 = scalar_lea.hbm %s792_s2, 2048 }
  0x14   :  { %s31_s30 = sshll.u32 %s673_s29, 4  ;;  %p621_p8 = scmp.ne.s32.totalorder %s792_s2, %s620_s7  ;;  %s32_s30 = int_to_ptr.vmem [resolvable:$true] %s31_s30 }
  0x15   :  { %p624_p9 = scmp.lt.u32.totalorder %s620_s7, %s792_s2 }
  0x17   :  { %p626_p10 = pnand %p624_p9, %p621_p8 }
  0x19   :  { %629 = shalt.err (!%p626_p10)
}
  0x1a   :  { %s630_s12 = scalar_lea.vmem %s32_s30, 2048  ;;  %p635_p12 = scmp.lt.s32.totalorder %s32_s30, %s32_s30 }
  0x1b   :  { %p631_p11 = scmp.ne.s32.totalorder %s32_s30, %s630_s12  ;;  %p636_p13 = scmp.lt.s32.totalorder %s630_s12, %s630_s12 }
  0x1d   :  { %p637_p0 = por %p636_p13, %p635_p12 }
  0x1f   :  { %p638_p1 = pnand %p637_p0, %p631_p11 }
  0x21   :  { %641 = shalt.err (!%p638_p1)
}
  0x22   :  { %37 = dma.hbm_to_vmem [thread:$0]  %s792_s2, 2048, %s32_s30, [#allocation6], %s671_s25, %s671_s25, %s672_s26  }
  0x23   :  { %664 = dma.done.wait [#allocation3], 4096  }
  0x24   :  { %665 = vsyncadd [#allocation3], 4294963200 }
  0x25   :  { %666 = dma.done.wait [#allocation6], 2048  }
  0x26   :  { %667 = vsyncadd [#allocation6], 4294965248  ;;  %v674_v0 = vmov 0   ;;  %v675_v1 = vmov 0.0|0.0   ;;  %v46_v2 = vld [vmem:[%s790_s0] sm:$0xff]  ;;  %v64_v3 = vld [vmem:[#allocation2] sm:$0xff]  ;;  %v53_v43 = vlaneseq }
  0x27   :  { %591 = vset.pattern.permute.xlu0 %v674_v0  ;;  %510 = vmatprep.subr.bf16.mxu0 %v675_v1  ;;  %v65_v4 = vld [vmem:[#allocation2 + $0x8] sm:$0xff]  ;;  %v66_v6 = vld [vmem:[#allocation2 + $0x10] sm:$0xff]  ;;  %v67_v7 = vld [vmem:[#allocation2 + $0x18] sm:$0xff]  ;;  %vm676_vm0 = vmmov 0   ;;  %v677_v11 = vmov 0.0  }
  0x28   :  { %534 = vmatprep.subr.bf16.mxu1 %v675_v1  ;;  %50 = vperm.xlu0 %591, %v46_v2   ;;  %v511_v5 = vpack.c.bf16 %v65_v4, %v64_v3  ;;  %v514_v8 = vpack.c.bf16 %v67_v7, %v66_v6  ;;  %v68_v9 = vld [vmem:[#allocation2 + $0x20] sm:$0xff]  ;;  %v69_v10 = vld [vmem:[#allocation2 + $0x28] sm:$0xff]  ;;  %v70_v13 = vld [vmem:[#allocation2 + $0x30] sm:$0xff]  ;;  %v750_v44 = vshrl.u32 %v53_v43, 7 }
  0x29   :  { %437 = vmatprep.mubr.msk.f32.mxu0 %vm676_vm0, %v677_v11  ;;  %472 = vmatprep.mubr.msk.f32.mxu1 %vm676_vm0, %v677_v11  ;;  %v517_v12 = vpack.c.bf16 %v69_v10, %v68_v9  ;;  %v71_v14 = vld [vmem:[#allocation2 + $0x38] sm:$0xff]  ;;  %v72_v16 = vld [vmem:[#allocation2 + $0x40] sm:$0xff]  ;;  %v73_v17 = vld [vmem:[#allocation2 + $0x48] sm:$0xff] }
  0x2a   :  { %512 = vmatpush3.bf16.msra.mxu0 %v511_v5  ;;  %v520_v15 = vpack.c.bf16 %v71_v14, %v70_v13  ;;  %v523_v18 = vpack.c.bf16 %v73_v17, %v72_v16  ;;  %v74_v19 = vld [vmem:[#allocation2 + $0x50] sm:$0xff]  ;;  %v75_v20 = vld [vmem:[#allocation2 + $0x58] sm:$0xff]  ;;  %v156_v21 = vld [vmem:[#allocation2 + $0x80] sm:$0xff]  ;;  %v55_v45 = vsub.s32 0, %v750_v44  ;;  %v60_v47 = vsub.s32 1, %v750_v44 }
  0x2b   :  { %513 = vmatprep.subr.bf16.mxu0 %v675_v1  ;;  %v157_v22 = vld [vmem:[#allocation2 + $0x88] sm:$0xff]  ;;  %v158_v23 = vld [vmem:[#allocation2 + $0x90] sm:$0xff]  ;;  %v159_v25 = vld [vmem:[#allocation2 + $0x98] sm:$0xff]  ;;  %v526_v26 = vpack.c.bf16 %v75_v20, %v74_v19 }
  0x2c   :  { %v535_v24 = vpack.c.bf16 %v157_v22, %v156_v21  ;;  %v76_v27 = vld [vmem:[#allocation2 + $0x60] sm:$0xff]  ;;  %v538_v28 = vpack.c.bf16 %v159_v25, %v158_v23  ;;  %v77_v29 = vld [vmem:[#allocation2 + $0x68] sm:$0xff]  ;;  %v78_v33 = vld [vmem:[#allocation2 + $0x70] sm:$0xff] }
  0x2d   :  { %v160_v30 = vld [vmem:[#allocation2 + $0xa0] sm:$0xff]  ;;  %v161_v31 = vld [vmem:[#allocation2 + $0xa8] sm:$0xff]  ;;  %v529_v32 = vpack.c.bf16 %v77_v29, %v76_v27  ;;  %v79_v35 = vld [vmem:[#allocation2 + $0x78] sm:$0xff] }
  0x2e   :  { %515 = vmatpush3.bf16.msra.mxu0 %v514_v8  ;;  %536 = vmatpush3.bf16.msra.mxu1 %v535_v24  ;;  %v541_v34 = vpack.c.bf16 %v161_v31, %v160_v30  ;;  %v162_v36 = vld [vmem:[#allocation2 + $0xb0] sm:$0xff]  ;;  %v163_v37 = vld [vmem:[#allocation2 + $0xb8] sm:$0xff]  ;;  %v532_v38 = vpack.c.bf16 %v79_v35, %v78_v33  ;;  %v164_v40 = vld [vmem:[#allocation2 + $0xc0] sm:$0xff]  ;;  %v174_v30 = vsub.s32 3, %v750_v44 }
  0x2f   :  { %516 = vmatprep.subr.bf16.mxu0 %v675_v1  ;;  %537 = vmatprep.subr.bf16.mxu1 %v675_v1  ;;  %v544_v39 = vpack.c.bf16 %v163_v37, %v162_v36  ;;  %v165_v41 = vld [vmem:[#allocation2 + $0xc8] sm:$0xff]  ;;  %v756_v46 = vld [vmem:[%s793_s3] sm:$0x1f]  ;;  %v167_v55 = vld [vmem:[#allocation2 + $0xd8] sm:$0xff]  ;;  %v265_v36 = vsub.s32 4, %v750_v44  ;;  %s678_s3 = smov [#allocation7]  }
  0x30   :  { %v547_v42 = vpack.c.bf16 %v165_v41, %v164_v40  ;;  %v56_v48 = vrot.slane %v756_v46, %v55_v45  ;;  %v61_v49 = vrot.slane %v756_v46, %v60_v47  ;;  %v166_v54 = vld [vmem:[#allocation2 + $0xd0] sm:$0xff]  ;;  %v168_v57 = vld [vmem:[#allocation2 + $0xe0] sm:$0xff]  ;;  %v169_v58 = vld [vmem:[#allocation2 + $0xe8] sm:$0xff]  ;;  %v175_v31 = vrot.slane %v756_v46, %v174_v30  ;;  %s344_s16 = sshll.u32 %s678_s3, 4  ;;  %s345_s16 = int_to_ptr.vmem [resolvable:$true] %s344_s16 }
  0x31   :  { %v550_v56 = vpack.c.bf16 %v167_v55, %v166_v54  ;;  %v553_v59 = vpack.c.bf16 %v169_v58, %v168_v57  ;;  %v170_v60 = vld [vmem:[#allocation2 + $0xf0] sm:$0xff]  ;;  %v171_v61 = vld [vmem:[#allocation2 + $0xf8] sm:$0xff]  ;;  %v247_v63 = vld [vmem:[#allocation5] sm:$0xff]  ;;  %v266_v37 = vrot.slane %v756_v46, %v265_v36  ;;  %s642_s17 = scalar_lea.vmem %s345_s16, 128  ;;  %p647_p3 = scmp.lt.s32.totalorder %s345_s16, %s345_s16 }
  0x32   :  { %518 = vmatpush3.bf16.msra.mxu0 %v517_v12  ;;  %539 = vmatpush3.bf16.msra.mxu1 %v538_v28  ;;  %v556_v62 = vpack.c.bf16 %v171_v61, %v170_v60  ;;  %v248_v0 = vld [vmem:[#allocation5 + $0x8] sm:$0xff]  ;;  %v249_v2 = vld [vmem:[#allocation5 + $0x10] sm:$0xff]  ;;  %v250_v4 = vld [vmem:[#allocation5 + $0x18] sm:$0xff]  ;;  %p643_p2 = scmp.ne.s32.totalorder %s345_s16, %s642_s17  ;;  %p648_p4 = scmp.lt.s32.totalorder %s642_s17, %s642_s17 }
  0x33   :  { %519 = vmatprep.subr.bf16.mxu0 %v675_v1  ;;  %540 = vmatprep.subr.bf16.mxu1 %v675_v1  ;;  %v559_v3 = vpack.c.bf16 %v248_v0, %v247_v63  ;;  %v562_v5 = vpack.c.bf16 %v250_v4, %v249_v2  ;;  %v251_v6 = vld [vmem:[#allocation5 + $0x20] sm:$0xff]  ;;  %v252_v7 = vld [vmem:[#allocation5 + $0x28] sm:$0xff]  ;;  %v253_v9 = vld [vmem:[#allocation5 + $0x30] sm:$0xff] }
  0x34   :  { %v565_v8 = vpack.c.bf16 %v252_v7, %v251_v6  ;;  %v254_v10 = vld [vmem:[#allocation5 + $0x38] sm:$0xff]  ;;  %v255_v12 = vld [vmem:[#allocation5 + $0x40] sm:$0xff]  ;;  %v256_v13 = vld [vmem:[#allocation5 + $0x48] sm:$0xff]  ;;  %p649_p5 = por %p648_p4, %p647_p3 }
  0x35   :  { %v571_v14 = vpack.c.bf16 %v256_v13, %v255_v12  ;;  %v257_v21 = vld [vmem:[#allocation5 + $0x50] sm:$0xff]  ;;  %v258_v22 = vld [vmem:[#allocation5 + $0x58] sm:$0xff]  ;;  %v259_v24 = vld [vmem:[#allocation5 + $0x60] sm:$0xff] }
  0x36   :  { %521 = vmatpush3.bf16.msra.mxu0 %v520_v15  ;;  %542 = vmatpush3.bf16.msra.mxu1 %v541_v34  ;;  %v82_v15 = vsub.s32 2, %v750_v44  ;;  %v574_v23 = vpack.c.bf16 %v258_v22, %v257_v21  ;;  %v260_v25 = vld [vmem:[#allocation5 + $0x68] sm:$0xff]  ;;  %v261_v27 = vld [vmem:[#allocation5 + $0x70] sm:$0xff]  ;;  %v262_v28 = vld [vmem:[#allocation5 + $0x78] sm:$0xff]  ;;  %p650_p6 = pnand %p649_p5, %p643_p2 }
  0x37   :  { %522 = vmatprep.subr.bf16.mxu0 %v675_v1  ;;  %543 = vmatprep.subr.bf16.mxu1 %v675_v1  ;;  %v580_v29 = vpack.c.bf16 %v262_v28, %v261_v27 }
  0x38   :  { %v83_v16 = vrot.slane %v756_v46, %v82_v15 }
  0x3a   :  { %524 = vmatpush3.bf16.msra.mxu0 %v523_v18  ;;  %545 = vmatpush3.bf16.msra.mxu1 %v544_v39 }
  0x3b   :  { %525 = vmatprep.subr.bf16.mxu0 %v675_v1  ;;  %546 = vmatprep.subr.bf16.mxu1 %v675_v1 }
  0x3e   :  { %527 = vmatpush3.bf16.msra.mxu0 %v526_v26  ;;  %548 = vmatpush3.bf16.msra.mxu1 %v547_v42  ;;  %v577_v26 = vpack.c.bf16 %v260_v25, %v259_v24 }
  0x3f   :  { %528 = vmatprep.subr.bf16.mxu0 %v675_v1  ;;  %549 = vmatprep.subr.bf16.mxu1 %v675_v1 }
  0x42   :  { %530 = vmatpush3.bf16.msra.mxu0 %v529_v32  ;;  %551 = vmatpush3.bf16.msra.mxu1 %v550_v56 }
  0x43   :  { %531 = vmatprep.subr.bf16.mxu0 %v675_v1  ;;  %552 = vmatprep.subr.bf16.mxu1 %v675_v1 }
  0x46   :  { %533 = vmatpush3.bf16.msra.mxu0 %v532_v38  ;;  %554 = vmatpush3.bf16.msra.mxu1 %v553_v59 }
  0x47   :  { %558 = vmatprep.subr.bf16.mxu0 %v675_v1  ;;  %555 = vmatprep.subr.bf16.mxu1 %v675_v1 }
  0x4a   :  { %557 = vmatpush3.bf16.msra.mxu1 %v556_v62 }
  0xa7   :  { %v51_v50 = vpop.permute.xlu0 %50 }
  0xa8   :  { %v57_v51 = vmul.f32 %v56_v48, %v51_v50 }
  0xaa   :  { %v62_v52 = vadd.f32 %v61_v49, %v57_v51 }
  0xac   :  { %592 = vtanh.f32 %v62_v52 }
  0xb6   :  { %v593_v53 = vpop.eup %592 }
  0xb7   :  { %438 = vmatmul.mubr.f32.vlgmr.msra.gmra.mrb[0].mxu0 %v593_v53 }
  0xb8   :  { %507 = vmatprep.mubr.msk.f32.mxu0 %vm676_vm0, %v677_v11  ;;  %560 = vmatpush3.bf16.msra.mxu0 %v559_v3  ;;  %v568_v11 = vpack.c.bf16 %v254_v10, %v253_v9 }
  0xb9   :  { %561 = vmatprep.subr.bf16.mxu0 %v675_v1 }
  0xbc   :  { %563 = vmatpush3.bf16.msra.mxu0 %v562_v5 }
  0xbd   :  { %564 = vmatprep.subr.bf16.mxu0 %v675_v1 }
  0xc0   :  { %566 = vmatpush3.bf16.msra.mxu0 %v565_v8 }
  0xc1   :  { %567 = vmatprep.subr.bf16.mxu0 %v675_v1 }
  0xc4   :  { %569 = vmatpush3.bf16.msra.mxu0 %v568_v11 }
  0xc5   :  { %570 = vmatprep.subr.bf16.mxu0 %v675_v1 }
  0xc8   :  { %572 = vmatpush3.bf16.msra.mxu0 %v571_v14 }
  0xc9   :  { %573 = vmatprep.subr.bf16.mxu0 %v675_v1 }
  0xcc   :  { %575 = vmatpush3.bf16.msra.mxu0 %v574_v23 }
  0xcd   :  { %576 = vmatprep.subr.bf16.mxu0 %v675_v1 }
  0xd0   :  { %578 = vmatpush3.bf16.msra.mxu0 %v577_v26 }
  0xd1   :  { %579 = vmatprep.subr.bf16.mxu0 %v675_v1 }
  0xd4   :  { %581 = vmatpush3.bf16.msra.mxu0 %v580_v29 }
 0x18a   :  { %v150_v17 = vpop.f32.mrb[0].mxu0 }
 0x18b   :  { %v151_v18 = vadd.f32 %v150_v17, %v83_v16  ;;  %v439_v19 = vpop.f32.mrb[1].mxu0 }
 0x18d   :  { %594 = vtanh.f32 %v151_v18 }
 0x197   :  { %v595_v20 = vpop.eup %594 }
 0x198   :  { %473 = vmatmul.mubr.f32.vlgmr.msra.gmra.mrb[0].mxu1 %v595_v20 }
 0x26b   :  { %v242_v32 = vpop.f32.mrb[0].mxu1 }
 0x26c   :  { %v243_v33 = vadd.f32 %v242_v32, %v175_v31  ;;  %v474_v34 = vpop.f32.mrb[1].mxu1 }
 0x26e   :  { %596 = vtanh.f32 %v243_v33 }
 0x278   :  { %v597_v35 = vpop.eup %596 }
 0x279   :  { %508 = vmatmul.mubr.f32.vlgmr.msra.gmra.mrb[2].mxu0 %v597_v35 }
 0x34c   :  { %v333_v38 = vpop.f32.mrb[2].mxu0 }
 0x34d   :  { %v334_v39 = vadd.f32 %v333_v38, %v266_v37  ;;  %v509_v1 = vpop.f32.mrb[3].mxu0 }
 0x34f   :  { %337 = vst [vmem:[#allocation7] sm:$0xff] %v334_v39 }
 0x350   :  { %653 = shalt.err (!%p650_p6)
}
 0x351   :  { %s654_s20 = scalar_lea.hbm %s794_s4, 128 }
 0x352   :  { %p655_p7 = scmp.ne.s32.totalorder %s794_s4, %s654_s20  ;;  %p658_p8 = scmp.lt.u32.totalorder %s654_s20, %s794_s4 }
 0x354   :  { %p660_p9 = pnand %p658_p8, %p655_p7 }
 0x356   :  { %663 = shalt.err (!%p660_p9)
}
 0x357   :  { %347 = dma.vmem_to_hbm [thread:$0]  %s345_s16, 128, %s794_s4, [#allocation4]  }
 0x358   :  { %668 = dma.done.wait [#allocation4], 128  }
 0x359   :  { %669 = vsyncadd [#allocation4], 4294967168 }
 0x35a   :  { %351 = vsyncpa [#allocation3], 1 }
 0x35b   :  { %352 = vsyncpa [#allocation6], 1 }
 0x35c   :  { %353 = vsyncpa [#allocation4], 1 }

</bundles_post_ra>
